<compile_context>
chip_gen: v5e
topology: v5e:2x2
jax: 0.10.0
libtpu: 0.0.40
codegen_flags: <defaults>
</compile_context>

<pallas_src>
import functools

import jax
import jax.numpy as jnp
from jax.experimental import pallas as pl
from jax.experimental.pallas import tpu as pltpu

# Layer sizes of the PyTorch module.
N_IN, H1, H2, H3 = 8, 4, 2, 1

# Flat parameter layout (row-major weights, torch (out_features, in_features)).
W1_OFF = 0
B1_OFF = W1_OFF + H1 * N_IN          # 32
W2_OFF = B1_OFF + H1                 # 36
B2_OFF = W2_OFF + H2 * H1            # 44
W3_OFF = B2_OFF + H2                 # 46
B3_OFF = W3_OFF + H3 * H2            # 48
N_PARAMS = B3_OFF + H3               # 49


def _round_up(x, m):
    return ((x + m - 1) // m) * m


def _dense_sigmoid_rows(rows, p_ref, w_off, b_off, n_out, k_in):
    """sigmoid(W @ rows + b) with scalar weights read from SMEM.

    rows: list of k_in feature rows, each shaped (1, TB) (batch on lanes).
    Returns n_out rows of shape (1, TB).

    The negated pre-activation is accumulated with negated *scalar* weights
    (free on the scalar unit), so sigmoid(z) = 1/(1+exp(-z)) needs no VPU
    negate; exp and the approximate reciprocal both run on the EUP.
    """
    outs = []
    for n in range(n_out):
        neg_z = rows[0] * (-p_ref[w_off + n * k_in + 0])
        for k in range(1, k_in):
            neg_z = neg_z + rows[k] * (-p_ref[w_off + n * k_in + k])
        neg_z = neg_z - p_ref[b_off + n]
        outs.append(pl.reciprocal(1.0 + jnp.exp(neg_z), approx=True))
    return outs


def mlp_kernel(x_ref, p_ref, o_ref):
    # x_ref: (8, TB)  VMEM block — features on sublanes, batch on lanes.
    # p_ref: (49,)    SMEM      — all weights/biases as f32 scalars.
    # o_ref: (1, TB)  VMEM block — lane-dense output stores (no vst.msk).
    x_rows = [x_ref[k:k + 1, :] for k in range(N_IN)]             # 8 x (1, TB)
    h1 = _dense_sigmoid_rows(x_rows, p_ref, W1_OFF, B1_OFF, H1, N_IN)
    h2 = _dense_sigmoid_rows(h1, p_ref, W2_OFF, B2_OFF, H2, H1)
    h3 = _dense_sigmoid_rows(h2, p_ref, W3_OFF, B3_OFF, H3, H2)
    o_ref[...] = h3[0].astype(o_ref.dtype)


@functools.partial(jax.jit, static_argnames=("block_b", "min_grid_steps"))
def mlp_forward_fm(x_fm, params, *, block_b=16384, min_grid_steps=4):
    """Fast path: feature-major input.

    x_fm:   (8, B)  float32 — batch on the trailing (lane) axis, so there is
                              no wrapper-side transpose / extra HBM pass.
    params: (49,)   float32 — see pack_params().
    Returns (1, B)  float32.
    """
    F, B = x_fm.shape
    assert F == N_IN and params.shape == (N_PARAMS,)

    # Tile selection:
    #   * as large as block_b (>=16K lanes amortises the ~0.35 us/step
    #     pipeline overhead; VMEM footprint stays trivially small),
    #   * but small enough that the "parallel" batch axis has at least
    #     `min_grid_steps` grid steps (keeps both v7x TensorCores busy),
    #   * always a multiple of 128 lanes, never below one vreg width.
    b128 = _round_up(B, 128)
    cap = _round_up(block_b, 128)
    target = _round_up(pl.cdiv(b128, min_grid_steps), 128)
    tb = max(128, min(cap, target, b128))
    b_pad = _round_up(B, tb)
    grid = (b_pad // tb,)

    if b_pad != B:   # only tile-ragged batches pay for a (small) pad copy
        x_fm = jnp.pad(x_fm, ((0, 0), (0, b_pad - B)))

    out = pl.pallas_call(
        mlp_kernel,
        out_shape=jax.ShapeDtypeStruct((1, b_pad), jnp.float32),
        grid=grid,
        in_specs=[
            pl.BlockSpec((N_IN, tb), lambda i: (0, i)),           # batch tiles
            pl.BlockSpec(memory_space=pltpu.MemorySpace.SMEM),    # 49 scalars
        ],
        out_specs=pl.BlockSpec((1, tb), lambda i: (0, i)),        # lane-dense
        compiler_params=pltpu.CompilerParams(
            dimension_semantics=("parallel",),
        ),
    )(x_fm, params)

    return out[:, :B]


@functools.partial(jax.jit, static_argnames=("block_b",))
def mlp_forward(x, params, *, block_b=16384):
    """Module-equivalent entry point: x (B, 8) float32 -> (B, 1) float32.

    Does a single transpose to the feature-major layout; producers that can
    supply (8, B) batches directly should call mlp_forward_fm instead.
    """
    B, F = x.shape
    assert F == N_IN
    out = mlp_forward_fm(x.T, params, block_b=block_b)            # (1, B)
    return out.reshape(B, 1)


def init_linear(key, fan_in, fan_out):
    # torch.nn.Linear default init: U(-1/sqrt(fan_in), 1/sqrt(fan_in));
    # weight stored (out_features, in_features) like torch.
    kw, kb = jax.random.split(key)
    bound = 1.0 / jnp.sqrt(jnp.float32(fan_in))
    w = jax.random.uniform(kw, (fan_out, fan_in), jnp.float32, -bound, bound)
    b = jax.random.uniform(kb, (fan_out,), jnp.float32, -bound, bound)
    return w, b


def pack_params(w1, b1, w2, b2, w3, b3):
    """Pack all weights/biases into one flat (49,) f32 vector (SMEM layout)."""
    return jnp.concatenate([
        w1.reshape(-1), b1.reshape(-1),
        w2.reshape(-1), b2.reshape(-1),
        w3.reshape(-1), b3.reshape(-1),
    ]).astype(jnp.float32)


def ref_forward(x, w1, b1, w2, b2, w3, b3):
    hp = jax.lax.Precision.HIGHEST
    h = jax.nn.sigmoid(jnp.dot(x, w1.T, precision=hp) + b1)
    h = jax.nn.sigmoid(jnp.dot(h, w2.T, precision=hp) + b2)
    h = jax.nn.sigmoid(jnp.dot(h, w3.T, precision=hp) + b3)
    return h


if __name__ == "__main__":
    key = jax.random.PRNGKey(0)
    kx1, kx2, kx3, k1, k2, k3 = jax.random.split(key, 6)

    w1, b1 = init_linear(k1, 8, 4)
    w2, b2 = init_linear(k2, 4, 2)
    w3, b3 = init_linear(k3, 2, 1)
    params = pack_params(w1, b1, w2, b2, w3, b3)

    TOL = 2e-3  # headroom for the approximate EUP reciprocal in the sigmoid

    # 1) Small DataLoader-style batch through the module-equivalent (B,8) API.
    x_small = jax.random.normal(kx1, (8, 8), jnp.float32)
    out_small = jax.block_until_ready(mlp_forward(x_small, params))
    ref_small = ref_forward(x_small, w1, b1, w2, b2, w3, b3)
    assert out_small.shape == (8, 1)
    assert jnp.allclose(out_small, ref_small, atol=TOL), "mismatch (small batch)"

    # 2) Ragged batch exercising the multi-step grid + padded-tail path.
    x_rag = jax.random.normal(kx2, (300, 8), jnp.float32)
    out_rag = jax.block_until_ready(mlp_forward(x_rag, params, block_b=128))
    ref_rag = ref_forward(x_rag, w1, b1, w2, b2, w3, b3)
    assert out_rag.shape == (300, 1)
    assert jnp.allclose(out_rag, ref_rag, atol=TOL), "mismatch (ragged batch)"

    # 3) Feature-major fast path with the automatic tile/grid selection
    #    (B=4096 -> tb=1024, 4 "parallel" grid steps, no transpose pass).
    x_fm = jax.random.normal(kx3, (8, 4096), jnp.float32)
    out_fm = jax.block_until_ready(mlp_forward_fm(x_fm, params))
    ref_fm = ref_forward(x_fm.T, w1, b1, w2, b2, w3, b3)
    assert out_fm.shape == (1, 4096)
    assert jnp.allclose(out_fm[0], ref_fm[:, 0], atol=TOL), "mismatch (feature-major)"

    print("KERNEL_OK")
</pallas_src>

<mosaic_0001>
module attributes {stable_mosaic.version = 11 : i64} {
  func.func @mlp_kernel(%arg0: i32, %arg1: memref<8x128xf32, #tpu.memory_space<vmem>>, %arg2: memref<49xf32, #tpu.memory_space<smem>>, %arg3: memref<1x128xf32, #tpu.memory_space<vmem>>) attributes {dimension_semantics = [#tpu.dimension_semantics<parallel>], iteration_bounds = array<i64: 1>, scalar_prefetch = 0 : i64, scratch_operands = 0 : i64, tpu.core_type = #tpu.core_type<tc>, window_params = [{transform_indices = @transform_0, window_bounds = array<i64: 8, 128>}, {transform_indices = @transform_1, window_bounds = array<i64: 49>}, {transform_indices = @transform_2, window_bounds = array<i64: 1, 128>}]} {
    %c0 = arith.constant 0 : index
    %c0_0 = arith.constant 0 : index
    %0 = vector.load %arg1[%c0, %c0_0] : memref<8x128xf32, #tpu.memory_space<vmem>>, vector<1x128xf32>
    %c1 = arith.constant 1 : index
    %c0_1 = arith.constant 0 : index
    %1 = vector.load %arg1[%c1, %c0_1] : memref<8x128xf32, #tpu.memory_space<vmem>>, vector<1x128xf32>
    %c2 = arith.constant 2 : index
    %c0_2 = arith.constant 0 : index
    %2 = vector.load %arg1[%c2, %c0_2] : memref<8x128xf32, #tpu.memory_space<vmem>>, vector<1x128xf32>
    %c3 = arith.constant 3 : index
    %c0_3 = arith.constant 0 : index
    %3 = vector.load %arg1[%c3, %c0_3] : memref<8x128xf32, #tpu.memory_space<vmem>>, vector<1x128xf32>
    %c4 = arith.constant 4 : index
    %c0_4 = arith.constant 0 : index
    %4 = vector.load %arg1[%c4, %c0_4] : memref<8x128xf32, #tpu.memory_space<vmem>>, vector<1x128xf32>
    %c5 = arith.constant 5 : index
    %c0_5 = arith.constant 0 : index
    %5 = vector.load %arg1[%c5, %c0_5] : memref<8x128xf32, #tpu.memory_space<vmem>>, vector<1x128xf32>
    %c6 = arith.constant 6 : index
    %c0_6 = arith.constant 0 : index
    %6 = vector.load %arg1[%c6, %c0_6] : memref<8x128xf32, #tpu.memory_space<vmem>>, vector<1x128xf32>
    %c7 = arith.constant 7 : index
    %c0_7 = arith.constant 0 : index
    %7 = vector.load %arg1[%c7, %c0_7] : memref<8x128xf32, #tpu.memory_space<vmem>>, vector<1x128xf32>
    %c0_8 = arith.constant 0 : index
    %8 = memref.load %arg2[%c0_8] : memref<49xf32, #tpu.memory_space<smem>>
    %cst = arith.constant 0.000000e+00 : f32
    %9 = arith.subf %cst, %8 : f32
    %10 = vector.broadcast %9 : f32 to vector<1x128xf32>
    %11 = arith.mulf %0, %10 : vector<1x128xf32>
    %c1_9 = arith.constant 1 : index
    %12 = memref.load %arg2[%c1_9] : memref<49xf32, #tpu.memory_space<smem>>
    %cst_10 = arith.constant 0.000000e+00 : f32
    %13 = arith.subf %cst_10, %12 : f32
    %14 = vector.broadcast %13 : f32 to vector<1x128xf32>
    %15 = arith.mulf %1, %14 : vector<1x128xf32>
    %16 = arith.addf %11, %15 : vector<1x128xf32>
    %c2_11 = arith.constant 2 : index
    %17 = memref.load %arg2[%c2_11] : memref<49xf32, #tpu.memory_space<smem>>
    %cst_12 = arith.constant 0.000000e+00 : f32
    %18 = arith.subf %cst_12, %17 : f32
    %19 = vector.broadcast %18 : f32 to vector<1x128xf32>
    %20 = arith.mulf %2, %19 : vector<1x128xf32>
    %21 = arith.addf %16, %20 : vector<1x128xf32>
    %c3_13 = arith.constant 3 : index
    %22 = memref.load %arg2[%c3_13] : memref<49xf32, #tpu.memory_space<smem>>
    %cst_14 = arith.constant 0.000000e+00 : f32
    %23 = arith.subf %cst_14, %22 : f32
    %24 = vector.broadcast %23 : f32 to vector<1x128xf32>
    %25 = arith.mulf %3, %24 : vector<1x128xf32>
    %26 = arith.addf %21, %25 : vector<1x128xf32>
    %c4_15 = arith.constant 4 : index
    %27 = memref.load %arg2[%c4_15] : memref<49xf32, #tpu.memory_space<smem>>
    %cst_16 = arith.constant 0.000000e+00 : f32
    %28 = arith.subf %cst_16, %27 : f32
    %29 = vector.broadcast %28 : f32 to vector<1x128xf32>
    %30 = arith.mulf %4, %29 : vector<1x128xf32>
    %31 = arith.addf %26, %30 : vector<1x128xf32>
    %c5_17 = arith.constant 5 : index
    %32 = memref.load %arg2[%c5_17] : memref<49xf32, #tpu.memory_space<smem>>
    %cst_18 = arith.constant 0.000000e+00 : f32
    %33 = arith.subf %cst_18, %32 : f32
    %34 = vector.broadcast %33 : f32 to vector<1x128xf32>
    %35 = arith.mulf %5, %34 : vector<1x128xf32>
    %36 = arith.addf %31, %35 : vector<1x128xf32>
    %c6_19 = arith.constant 6 : index
    %37 = memref.load %arg2[%c6_19] : memref<49xf32, #tpu.memory_space<smem>>
    %cst_20 = arith.constant 0.000000e+00 : f32
    %38 = arith.subf %cst_20, %37 : f32
    %39 = vector.broadcast %38 : f32 to vector<1x128xf32>
    %40 = arith.mulf %6, %39 : vector<1x128xf32>
    %41 = arith.addf %36, %40 : vector<1x128xf32>
    %c7_21 = arith.constant 7 : index
    %42 = memref.load %arg2[%c7_21] : memref<49xf32, #tpu.memory_space<smem>>
    %cst_22 = arith.constant 0.000000e+00 : f32
    %43 = arith.subf %cst_22, %42 : f32
    %44 = vector.broadcast %43 : f32 to vector<1x128xf32>
    %45 = arith.mulf %7, %44 : vector<1x128xf32>
    %46 = arith.addf %41, %45 : vector<1x128xf32>
    %c32 = arith.constant 32 : index
    %47 = memref.load %arg2[%c32] : memref<49xf32, #tpu.memory_space<smem>>
    %48 = vector.broadcast %47 : f32 to vector<1x128xf32>
    %49 = arith.subf %46, %48 : vector<1x128xf32>
    %50 = math.exp %49 : vector<1x128xf32>
    %cst_23 = arith.constant 1.000000e+00 : f32
    %51 = vector.broadcast %cst_23 : f32 to vector<1x128xf32>
    %52 = arith.addf %51, %50 : vector<1x128xf32>
    %53 = tpu.reciprocal %52 {approx = true} : vector<1x128xf32> -> vector<1x128xf32>
    %c8 = arith.constant 8 : index
    %54 = memref.load %arg2[%c8] : memref<49xf32, #tpu.memory_space<smem>>
    %cst_24 = arith.constant 0.000000e+00 : f32
    %55 = arith.subf %cst_24, %54 : f32
    %56 = vector.broadcast %55 : f32 to vector<1x128xf32>
    %57 = arith.mulf %0, %56 : vector<1x128xf32>
    %c9 = arith.constant 9 : index
    %58 = memref.load %arg2[%c9] : memref<49xf32, #tpu.memory_space<smem>>
    %cst_25 = arith.constant 0.000000e+00 : f32
    %59 = arith.subf %cst_25, %58 : f32
    %60 = vector.broadcast %59 : f32 to vector<1x128xf32>
    %61 = arith.mulf %1, %60 : vector<1x128xf32>
    %62 = arith.addf %57, %61 : vector<1x128xf32>
    %c10 = arith.constant 10 : index
    %63 = memref.load %arg2[%c10] : memref<49xf32, #tpu.memory_space<smem>>
    %cst_26 = arith.constant 0.000000e+00 : f32
    %64 = arith.subf %cst_26, %63 : f32
    %65 = vector.broadcast %64 : f32 to vector<1x128xf32>
    %66 = arith.mulf %2, %65 : vector<1x128xf32>
    %67 = arith.addf %62, %66 : vector<1x128xf32>
    %c11 = arith.constant 11 : index
    %68 = memref.load %arg2[%c11] : memref<49xf32, #tpu.memory_space<smem>>
    %cst_27 = arith.constant 0.000000e+00 : f32
    %69 = arith.subf %cst_27, %68 : f32
    %70 = vector.broadcast %69 : f32 to vector<1x128xf32>
    %71 = arith.mulf %3, %70 : vector<1x128xf32>
    %72 = arith.addf %67, %71 : vector<1x128xf32>
    %c12 = arith.constant 12 : index
    %73 = memref.load %arg2[%c12] : memref<49xf32, #tpu.memory_space<smem>>
    %cst_28 = arith.constant 0.000000e+00 : f32
    %74 = arith.subf %cst_28, %73 : f32
    %75 = vector.broadcast %74 : f32 to vector<1x128xf32>
    %76 = arith.mulf %4, %75 : vector<1x128xf32>
    %77 = arith.addf %72, %76 : vector<1x128xf32>
    %c13 = arith.constant 13 : index
    %78 = memref.load %arg2[%c13] : memref<49xf32, #tpu.memory_space<smem>>
    %cst_29 = arith.constant 0.000000e+00 : f32
    %79 = arith.subf %cst_29, %78 : f32
    %80 = vector.broadcast %79 : f32 to vector<1x128xf32>
    %81 = arith.mulf %5, %80 : vector<1x128xf32>
    %82 = arith.addf %77, %81 : vector<1x128xf32>
    %c14 = arith.constant 14 : index
    %83 = memref.load %arg2[%c14] : memref<49xf32, #tpu.memory_space<smem>>
    %cst_30 = arith.constant 0.000000e+00 : f32
    %84 = arith.subf %cst_30, %83 : f32
    %85 = vector.broadcast %84 : f32 to vector<1x128xf32>
    %86 = arith.mulf %6, %85 : vector<1x128xf32>
    %87 = arith.addf %82, %86 : vector<1x128xf32>
    %c15 = arith.constant 15 : index
    %88 = memref.load %arg2[%c15] : memref<49xf32, #tpu.memory_space<smem>>
    %cst_31 = arith.constant 0.000000e+00 : f32
    %89 = arith.subf %cst_31, %88 : f32
    %90 = vector.broadcast %89 : f32 to vector<1x128xf32>
    %91 = arith.mulf %7, %90 : vector<1x128xf32>
    %92 = arith.addf %87, %91 : vector<1x128xf32>
    %c33 = arith.constant 33 : index
    %93 = memref.load %arg2[%c33] : memref<49xf32, #tpu.memory_space<smem>>
    %94 = vector.broadcast %93 : f32 to vector<1x128xf32>
    %95 = arith.subf %92, %94 : vector<1x128xf32>
    %96 = math.exp %95 : vector<1x128xf32>
    %cst_32 = arith.constant 1.000000e+00 : f32
    %97 = vector.broadcast %cst_32 : f32 to vector<1x128xf32>
    %98 = arith.addf %97, %96 : vector<1x128xf32>
    %99 = tpu.reciprocal %98 {approx = true} : vector<1x128xf32> -> vector<1x128xf32>
    %c16 = arith.constant 16 : index
    %100 = memref.load %arg2[%c16] : memref<49xf32, #tpu.memory_space<smem>>
    %cst_33 = arith.constant 0.000000e+00 : f32
    %101 = arith.subf %cst_33, %100 : f32
    %102 = vector.broadcast %101 : f32 to vector<1x128xf32>
    %103 = arith.mulf %0, %102 : vector<1x128xf32>
    %c17 = arith.constant 17 : index
    %104 = memref.load %arg2[%c17] : memref<49xf32, #tpu.memory_space<smem>>
    %cst_34 = arith.constant 0.000000e+00 : f32
    %105 = arith.subf %cst_34, %104 : f32
    %106 = vector.broadcast %105 : f32 to vector<1x128xf32>
    %107 = arith.mulf %1, %106 : vector<1x128xf32>
    %108 = arith.addf %103, %107 : vector<1x128xf32>
    %c18 = arith.constant 18 : index
    %109 = memref.load %arg2[%c18] : memref<49xf32, #tpu.memory_space<smem>>
    %cst_35 = arith.constant 0.000000e+00 : f32
    %110 = arith.subf %cst_35, %109 : f32
    %111 = vector.broadcast %110 : f32 to vector<1x128xf32>
    %112 = arith.mulf %2, %111 : vector<1x128xf32>
    %113 = arith.addf %108, %112 : vector<1x128xf32>
    %c19 = arith.constant 19 : index
    %114 = memref.load %arg2[%c19] : memref<49xf32, #tpu.memory_space<smem>>
    %cst_36 = arith.constant 0.000000e+00 : f32
    %115 = arith.subf %cst_36, %114 : f32
    %116 = vector.broadcast %115 : f32 to vector<1x128xf32>
    %117 = arith.mulf %3, %116 : vector<1x128xf32>
    %118 = arith.addf %113, %117 : vector<1x128xf32>
    %c20 = arith.constant 20 : index
    %119 = memref.load %arg2[%c20] : memref<49xf32, #tpu.memory_space<smem>>
    %cst_37 = arith.constant 0.000000e+00 : f32
    %120 = arith.subf %cst_37, %119 : f32
    %121 = vector.broadcast %120 : f32 to vector<1x128xf32>
    %122 = arith.mulf %4, %121 : vector<1x128xf32>
    %123 = arith.addf %118, %122 : vector<1x128xf32>
    %c21 = arith.constant 21 : index
    %124 = memref.load %arg2[%c21] : memref<49xf32, #tpu.memory_space<smem>>
    %cst_38 = arith.constant 0.000000e+00 : f32
    %125 = arith.subf %cst_38, %124 : f32
    %126 = vector.broadcast %125 : f32 to vector<1x128xf32>
    %127 = arith.mulf %5, %126 : vector<1x128xf32>
    %128 = arith.addf %123, %127 : vector<1x128xf32>
    %c22 = arith.constant 22 : index
    %129 = memref.load %arg2[%c22] : memref<49xf32, #tpu.memory_space<smem>>
    %cst_39 = arith.constant 0.000000e+00 : f32
    %130 = arith.subf %cst_39, %129 : f32
    %131 = vector.broadcast %130 : f32 to vector<1x128xf32>
    %132 = arith.mulf %6, %131 : vector<1x128xf32>
    %133 = arith.addf %128, %132 : vector<1x128xf32>
    %c23 = arith.constant 23 : index
    %134 = memref.load %arg2[%c23] : memref<49xf32, #tpu.memory_space<smem>>
    %cst_40 = arith.constant 0.000000e+00 : f32
    %135 = arith.subf %cst_40, %134 : f32
    %136 = vector.broadcast %135 : f32 to vector<1x128xf32>
    %137 = arith.mulf %7, %136 : vector<1x128xf32>
    %138 = arith.addf %133, %137 : vector<1x128xf32>
    %c34 = arith.constant 34 : index
    %139 = memref.load %arg2[%c34] : memref<49xf32, #tpu.memory_space<smem>>
    %140 = vector.broadcast %139 : f32 to vector<1x128xf32>
    %141 = arith.subf %138, %140 : vector<1x128xf32>
    %142 = math.exp %141 : vector<1x128xf32>
    %cst_41 = arith.constant 1.000000e+00 : f32
    %143 = vector.broadcast %cst_41 : f32 to vector<1x128xf32>
    %144 = arith.addf %143, %142 : vector<1x128xf32>
    %145 = tpu.reciprocal %144 {approx = true} : vector<1x128xf32> -> vector<1x128xf32>
    %c24 = arith.constant 24 : index
    %146 = memref.load %arg2[%c24] : memref<49xf32, #tpu.memory_space<smem>>
    %cst_42 = arith.constant 0.000000e+00 : f32
    %147 = arith.subf %cst_42, %146 : f32
    %148 = vector.broadcast %147 : f32 to vector<1x128xf32>
    %149 = arith.mulf %0, %148 : vector<1x128xf32>
    %c25 = arith.constant 25 : index
    %150 = memref.load %arg2[%c25] : memref<49xf32, #tpu.memory_space<smem>>
    %cst_43 = arith.constant 0.000000e+00 : f32
    %151 = arith.subf %cst_43, %150 : f32
    %152 = vector.broadcast %151 : f32 to vector<1x128xf32>
    %153 = arith.mulf %1, %152 : vector<1x128xf32>
    %154 = arith.addf %149, %153 : vector<1x128xf32>
    %c26 = arith.constant 26 : index
    %155 = memref.load %arg2[%c26] : memref<49xf32, #tpu.memory_space<smem>>
    %cst_44 = arith.constant 0.000000e+00 : f32
    %156 = arith.subf %cst_44, %155 : f32
    %157 = vector.broadcast %156 : f32 to vector<1x128xf32>
    %158 = arith.mulf %2, %157 : vector<1x128xf32>
    %159 = arith.addf %154, %158 : vector<1x128xf32>
    %c27 = arith.constant 27 : index
    %160 = memref.load %arg2[%c27] : memref<49xf32, #tpu.memory_space<smem>>
    %cst_45 = arith.constant 0.000000e+00 : f32
    %161 = arith.subf %cst_45, %160 : f32
    %162 = vector.broadcast %161 : f32 to vector<1x128xf32>
    %163 = arith.mulf %3, %162 : vector<1x128xf32>
    %164 = arith.addf %159, %163 : vector<1x128xf32>
    %c28 = arith.constant 28 : index
    %165 = memref.load %arg2[%c28] : memref<49xf32, #tpu.memory_space<smem>>
    %cst_46 = arith.constant 0.000000e+00 : f32
    %166 = arith.subf %cst_46, %165 : f32
    %167 = vector.broadcast %166 : f32 to vector<1x128xf32>
    %168 = arith.mulf %4, %167 : vector<1x128xf32>
    %169 = arith.addf %164, %168 : vector<1x128xf32>
    %c29 = arith.constant 29 : index
    %170 = memref.load %arg2[%c29] : memref<49xf32, #tpu.memory_space<smem>>
    %cst_47 = arith.constant 0.000000e+00 : f32
    %171 = arith.subf %cst_47, %170 : f32
    %172 = vector.broadcast %171 : f32 to vector<1x128xf32>
    %173 = arith.mulf %5, %172 : vector<1x128xf32>
    %174 = arith.addf %169, %173 : vector<1x128xf32>
    %c30 = arith.constant 30 : index
    %175 = memref.load %arg2[%c30] : memref<49xf32, #tpu.memory_space<smem>>
    %cst_48 = arith.constant 0.000000e+00 : f32
    %176 = arith.subf %cst_48, %175 : f32
    %177 = vector.broadcast %176 : f32 to vector<1x128xf32>
    %178 = arith.mulf %6, %177 : vector<1x128xf32>
    %179 = arith.addf %174, %178 : vector<1x128xf32>
    %c31 = arith.constant 31 : index
    %180 = memref.load %arg2[%c31] : memref<49xf32, #tpu.memory_space<smem>>
    %cst_49 = arith.constant 0.000000e+00 : f32
    %181 = arith.subf %cst_49, %180 : f32
    %182 = vector.broadcast %181 : f32 to vector<1x128xf32>
    %183 = arith.mulf %7, %182 : vector<1x128xf32>
    %184 = arith.addf %179, %183 : vector<1x128xf32>
    %c35 = arith.constant 35 : index
    %185 = memref.load %arg2[%c35] : memref<49xf32, #tpu.memory_space<smem>>
    %186 = vector.broadcast %185 : f32 to vector<1x128xf32>
    %187 = arith.subf %184, %186 : vector<1x128xf32>
    %188 = math.exp %187 : vector<1x128xf32>
    %cst_50 = arith.constant 1.000000e+00 : f32
    %189 = vector.broadcast %cst_50 : f32 to vector<1x128xf32>
    %190 = arith.addf %189, %188 : vector<1x128xf32>
    %191 = tpu.reciprocal %190 {approx = true} : vector<1x128xf32> -> vector<1x128xf32>
    %c36 = arith.constant 36 : index
    %192 = memref.load %arg2[%c36] : memref<49xf32, #tpu.memory_space<smem>>
    %cst_51 = arith.constant 0.000000e+00 : f32
    %193 = arith.subf %cst_51, %192 : f32
    %194 = vector.broadcast %193 : f32 to vector<1x128xf32>
    %195 = arith.mulf %53, %194 : vector<1x128xf32>
    %c37 = arith.constant 37 : index
    %196 = memref.load %arg2[%c37] : memref<49xf32, #tpu.memory_space<smem>>
    %cst_52 = arith.constant 0.000000e+00 : f32
    %197 = arith.subf %cst_52, %196 : f32
    %198 = vector.broadcast %197 : f32 to vector<1x128xf32>
    %199 = arith.mulf %99, %198 : vector<1x128xf32>
    %200 = arith.addf %195, %199 : vector<1x128xf32>
    %c38 = arith.constant 38 : index
    %201 = memref.load %arg2[%c38] : memref<49xf32, #tpu.memory_space<smem>>
    %cst_53 = arith.constant 0.000000e+00 : f32
    %202 = arith.subf %cst_53, %201 : f32
    %203 = vector.broadcast %202 : f32 to vector<1x128xf32>
    %204 = arith.mulf %145, %203 : vector<1x128xf32>
    %205 = arith.addf %200, %204 : vector<1x128xf32>
    %c39 = arith.constant 39 : index
    %206 = memref.load %arg2[%c39] : memref<49xf32, #tpu.memory_space<smem>>
    %cst_54 = arith.constant 0.000000e+00 : f32
    %207 = arith.subf %cst_54, %206 : f32
    %208 = vector.broadcast %207 : f32 to vector<1x128xf32>
    %209 = arith.mulf %191, %208 : vector<1x128xf32>
    %210 = arith.addf %205, %209 : vector<1x128xf32>
    %c44 = arith.constant 44 : index
    %211 = memref.load %arg2[%c44] : memref<49xf32, #tpu.memory_space<smem>>
    %212 = vector.broadcast %211 : f32 to vector<1x128xf32>
    %213 = arith.subf %210, %212 : vector<1x128xf32>
    %214 = math.exp %213 : vector<1x128xf32>
    %cst_55 = arith.constant 1.000000e+00 : f32
    %215 = vector.broadcast %cst_55 : f32 to vector<1x128xf32>
    %216 = arith.addf %215, %214 : vector<1x128xf32>
    %217 = tpu.reciprocal %216 {approx = true} : vector<1x128xf32> -> vector<1x128xf32>
    %c40 = arith.constant 40 : index
    %218 = memref.load %arg2[%c40] : memref<49xf32, #tpu.memory_space<smem>>
    %cst_56 = arith.constant 0.000000e+00 : f32
    %219 = arith.subf %cst_56, %218 : f32
    %220 = vector.broadcast %219 : f32 to vector<1x128xf32>
    %221 = arith.mulf %53, %220 : vector<1x128xf32>
    %c41 = arith.constant 41 : index
    %222 = memref.load %arg2[%c41] : memref<49xf32, #tpu.memory_space<smem>>
    %cst_57 = arith.constant 0.000000e+00 : f32
    %223 = arith.subf %cst_57, %222 : f32
    %224 = vector.broadcast %223 : f32 to vector<1x128xf32>
    %225 = arith.mulf %99, %224 : vector<1x128xf32>
    %226 = arith.addf %221, %225 : vector<1x128xf32>
    %c42 = arith.constant 42 : index
    %227 = memref.load %arg2[%c42] : memref<49xf32, #tpu.memory_space<smem>>
    %cst_58 = arith.constant 0.000000e+00 : f32
    %228 = arith.subf %cst_58, %227 : f32
    %229 = vector.broadcast %228 : f32 to vector<1x128xf32>
    %230 = arith.mulf %145, %229 : vector<1x128xf32>
    %231 = arith.addf %226, %230 : vector<1x128xf32>
    %c43 = arith.constant 43 : index
    %232 = memref.load %arg2[%c43] : memref<49xf32, #tpu.memory_space<smem>>
    %cst_59 = arith.constant 0.000000e+00 : f32
    %233 = arith.subf %cst_59, %232 : f32
    %234 = vector.broadcast %233 : f32 to vector<1x128xf32>
    %235 = arith.mulf %191, %234 : vector<1x128xf32>
    %236 = arith.addf %231, %235 : vector<1x128xf32>
    %c45 = arith.constant 45 : index
    %237 = memref.load %arg2[%c45] : memref<49xf32, #tpu.memory_space<smem>>
    %238 = vector.broadcast %237 : f32 to vector<1x128xf32>
    %239 = arith.subf %236, %238 : vector<1x128xf32>
    %240 = math.exp %239 : vector<1x128xf32>
    %cst_60 = arith.constant 1.000000e+00 : f32
    %241 = vector.broadcast %cst_60 : f32 to vector<1x128xf32>
    %242 = arith.addf %241, %240 : vector<1x128xf32>
    %243 = tpu.reciprocal %242 {approx = true} : vector<1x128xf32> -> vector<1x128xf32>
    %c46 = arith.constant 46 : index
    %244 = memref.load %arg2[%c46] : memref<49xf32, #tpu.memory_space<smem>>
    %cst_61 = arith.constant 0.000000e+00 : f32
    %245 = arith.subf %cst_61, %244 : f32
    %246 = vector.broadcast %245 : f32 to vector<1x128xf32>
    %247 = arith.mulf %217, %246 : vector<1x128xf32>
    %c47 = arith.constant 47 : index
    %248 = memref.load %arg2[%c47] : memref<49xf32, #tpu.memory_space<smem>>
    %cst_62 = arith.constant 0.000000e+00 : f32
    %249 = arith.subf %cst_62, %248 : f32
    %250 = vector.broadcast %249 : f32 to vector<1x128xf32>
    %251 = arith.mulf %243, %250 : vector<1x128xf32>
    %252 = arith.addf %247, %251 : vector<1x128xf32>
    %c48 = arith.constant 48 : index
    %253 = memref.load %arg2[%c48] : memref<49xf32, #tpu.memory_space<smem>>
    %254 = vector.broadcast %253 : f32 to vector<1x128xf32>
    %255 = arith.subf %252, %254 : vector<1x128xf32>
    %256 = math.exp %255 : vector<1x128xf32>
    %cst_63 = arith.constant 1.000000e+00 : f32
    %257 = vector.broadcast %cst_63 : f32 to vector<1x128xf32>
    %258 = arith.addf %257, %256 : vector<1x128xf32>
    %259 = tpu.reciprocal %258 {approx = true} : vector<1x128xf32> -> vector<1x128xf32>
    %c0_64 = arith.constant 0 : index
    %c0_65 = arith.constant 0 : index
    %260 = vector.load %arg3[%c0_64, %c0_65] : memref<1x128xf32, #tpu.memory_space<vmem>>, vector<1x128xf32>
    tpu.vector_store %arg3[%c0_64, %c0_65], %259 {strides = array<i32>} : memref<1x128xf32, #tpu.memory_space<vmem>>, vector<1x128xf32>,
    return
  }
  func.func @transform_0(%arg0: i32) -> (i32, i32) {
    %c0_i32 = arith.constant 0 : i32
    %c0_i32_0 = arith.constant 0 : i32
    return %c0_i32, %arg0 : i32, i32
  }
  func.func @transform_1(%arg0: i32) -> i32 {
    %c0_i32 = arith.constant 0 : i32
    %c0_i32_0 = arith.constant 0 : i32
    return %c0_i32 : i32
  }
  func.func @transform_2(%arg0: i32) -> (i32, i32) {
    %c0_i32 = arith.constant 0 : i32
    %c0_i32_0 = arith.constant 0 : i32
    return %c0_i32, %arg0 : i32, i32
  }
}

</mosaic_0001>

<bundles_post_ra>
// kernel: mlp_forward_fm.1
= control target key start
LH: loop header
LB: loop body
LE: loop exit
PB: predicated region body
PF: predicated region fallthrough
CT: control target
= control target key end

     0   :  { %7 = vsyncpa [#allocation4], 0  ;;  %s582_s0 = inlined_call_operand.vmem [shape: f32[8,128], index: 0, kind: input, shape index: {}]   ;;  %s583_s1 = inlined_call_operand.vmem [shape: f32[49], index: 1, kind: input, shape index: {}]   ;;  %s584_s2 = inlined_call_operand.hbm [shape: f32[1,128], index: 2, kind: output, shape index: {}]  }
   0x1   :  { %8 = vsyncpa [#allocation3], 0  ;;  %s16_s11 = sshll.u32 %s583_s1, 4  ;;  %s421_s12 = smov [#allocation2]   ;;  %s17_s11 = int_to_ptr.vmem [resolvable:$true] %s16_s11 }
   0x2   :  { %19 = dma.vmem_to_smem %s17_s11, 16, %s421_s12, [#allocation4]  }
   0x3   :  { %417 = dma.done.wait [#allocation4], 16  }
   0x4   :  { %418 = vsyncadd [#allocation4], 4294967280 }
   0x5   :  { %24 = sfence }
   0x6   :  { %s33_s13 = sld [smem:[#allocation2]]  ;;  %v460_v0 = vld [vmem:[%s582_s0] sm:$0x1]  ;;  %v465_v1 = vld [vmem:[%s582_s0 + $0x1] sm:$0x1] }
   0x7   :  { %s303_s14 = sld [smem:[#allocation2 + $0x1]]  ;;  %v473_v6 = vld [vmem:[%s582_s0 + $0x2] sm:$0x1]  ;;  %v483_v15 = vld [vmem:[%s582_s0 + $0x3] sm:$0x1] }
   0x8   :  { %s304_s15 = sld [smem:[#allocation2 + $0x2]]  ;;  %v498_v22 = vld [vmem:[%s582_s0 + $0x4] sm:$0x1]  ;;  %v510_v29 = vld [vmem:[%s582_s0 + $0x5] sm:$0x1] }
   0x9   :  { %s441_s16 = sld [smem:[#allocation2 + $0x3]]  ;;  %v523_v37 = vld [vmem:[%s582_s0 + $0x6] sm:$0x1]  ;;  %v536_v48 = vld [vmem:[%s582_s0 + $0x7] sm:$0x1] }
   0xa   :  { %s443_s17 = sld [smem:[#allocation2 + $0x4]] }
   0xb   :  { %s445_s18 = sld [smem:[#allocation2 + $0x5]] }
   0xc   :  { %s34_s19 = ssub.f32 0.0, %s33_s13 }
   0xd   :  { %s38_s1 = ssub.f32 0.0, %s303_s14 }
   0xe   :  { %s43_s20 = ssub.f32 0.0, %s304_s15  ;;  %v35_v2 = vstv %s34_s19 }
   0xf   :  { %s48_s21 = ssub.f32 0.0, %s441_s16  ;;  %v39_v3 = vstv %s38_s1  ;;  %v36_v4 = vmul.f32 %v35_v2, %v460_v0 }
  0x10   :  { %s53_s22 = ssub.f32 0.0, %s443_s17  ;;  %v40_v5 = vmul.f32 %v39_v3, %v465_v1  ;;  %v44_v7 = vstv %s43_s20 }
  0x11   :  { %s58_s23 = ssub.f32 0.0, %s445_s18  ;;  %v45_v14 = vmul.f32 %v44_v7, %v473_v6  ;;  %v49_v16 = vstv %s48_s21 }
  0x12   :  { %s450_s24 = sld [smem:[#allocation2 + $0x6]]  ;;  %v41_v13 = vadd.f32 %v40_v5, %v36_v4  ;;  %v50_v21 = vmul.f32 %v49_v16, %v483_v15  ;;  %v54_v23 = vstv %s53_s22 }
  0x13   :  { %s452_s25 = sld [smem:[#allocation2 + $0x7]]  ;;  %v55_v28 = vmul.f32 %v54_v23, %v498_v22  ;;  %v59_v30 = vstv %s58_s23 }
  0x14   :  { %s454_s26 = sld [smem:[#allocation2 + $0x20]]  ;;  %v46_v20 = vadd.f32 %v45_v14, %v41_v13  ;;  %v60_v35 = vmul.f32 %v59_v30, %v510_v29 }
  0x15   :  { %s311_s27 = sld [smem:[#allocation2 + $0x8]] }
  0x16   :  { %s312_s28 = sld [smem:[#allocation2 + $0x9]]  ;;  %v51_v27 = vadd.f32 %v50_v21, %v46_v20 }
  0x17   :  { %s313_s29 = sld [smem:[#allocation2 + $0xa]] }
  0x18   :  { %s63_s30 = ssub.f32 0.0, %s450_s24  ;;  %v56_v34 = vadd.f32 %v55_v28, %v51_v27 }
  0x19   :  { %s68_s7 = ssub.f32 0.0, %s452_s25 }
  0x1a   :  { %s314_s8 = sld [smem:[#allocation2 + $0xb]]  ;;  %v64_v36 = vstv %s63_s30  ;;  %v61_v42 = vadd.f32 %v60_v35, %v56_v34  ;;  %v73_v7 = vstv %s454_s26 }
  0x1b   :  { %s80_s9 = ssub.f32 0.0, %s311_s27  ;;  %v65_v44 = vmul.f32 %v64_v36, %v523_v37  ;;  %v69_v45 = vstv %s68_s7 }
  0x1c   :  { %s84_s10 = ssub.f32 0.0, %s312_s28  ;;  %v70_v58 = vmul.f32 %v69_v45, %v536_v48 }
  0x1d   :  { %v81_v8 = vstv %s80_s9  ;;  %s89_s13 = ssub.f32 0.0, %s313_s29  ;;  %v66_v57 = vadd.f32 %v65_v44, %v61_v42 }
  0x1e   :  { %v82_v9 = vmul.f32 %v81_v8, %v460_v0  ;;  %v85_v10 = vstv %s84_s10  ;;  %s315_s14 = sld [smem:[#allocation2 + $0xc]] }
  0x1f   :  { %v86_v11 = vmul.f32 %v85_v10, %v465_v1  ;;  %v90_v12 = vstv %s89_s13  ;;  %s477_s15 = sld [smem:[#allocation2 + $0xd]]  ;;  %v71_v5 = vadd.f32 %v70_v58, %v66_v57 }
  0x20   :  { %s94_s19 = ssub.f32 0.0, %s314_s8  ;;  %v91_v18 = vmul.f32 %v90_v12, %v473_v6 }
  0x21   :  { %s487_s20 = sld [smem:[#allocation2 + $0xe]]  ;;  %v87_v17 = vadd.f32 %v86_v11, %v82_v9  ;;  %v74_v14 = vsub.f32 %v71_v5, %v73_v7 }
  0x22   :  { %s490_s28 = sld [smem:[#allocation2 + $0xf]]  ;;  %v95_v19 = vstv %s94_s19 }
  0x23   :  { %s492_s29 = sld [smem:[#allocation2 + $0x21]]  ;;  %v92_v24 = vadd.f32 %v91_v18, %v87_v17  ;;  %v96_v25 = vmul.f32 %v95_v19, %v483_v15 }
  0x24   :  { %s99_s3 = ssub.f32 0.0, %s315_s14 }
  0x25   :  { %s104_s21 = ssub.f32 0.0, %s477_s15  ;;  %v97_v31 = vadd.f32 %v96_v25, %v92_v24  ;;  %v75_v25 = vmul.f32 1.442695, %v74_v14 }
  0x26   :  { %s320_s5 = sld [smem:[#allocation2 + $0x10]]  ;;  %v100_v26 = vstv %s99_s3 }
  0x27   :  { %s109_s6 = ssub.f32 0.0, %s487_s20  ;;  %v101_v32 = vmul.f32 %v100_v26, %v498_v22  ;;  %v105_v33 = vstv %s104_s21  ;;  %353 = vpow2.f32 %v75_v25 }
  0x28   :  { %s114_s8 = ssub.f32 0.0, %s490_s28  ;;  %v106_v39 = vmul.f32 %v105_v33, %v510_v29 }
  0x29   :  { %s321_s17 = sld [smem:[#allocation2 + $0x11]]  ;;  %v102_v38 = vadd.f32 %v101_v32, %v97_v31  ;;  %v110_v40 = vstv %s109_s6  ;;  %v119_v11 = vstv %s492_s29 }
  0x2a   :  { %s322_s22 = sld [smem:[#allocation2 + $0x12]]  ;;  %v111_v46 = vmul.f32 %v110_v40, %v523_v37  ;;  %v115_v50 = vstv %s114_s8 }
  0x2b   :  { %s323_s11 = sld [smem:[#allocation2 + $0x13]]  ;;  %v107_v49 = vadd.f32 %v106_v39, %v102_v38  ;;  %v116_v59 = vmul.f32 %v115_v50, %v536_v48 }
  0x2c   :  { %s126_s12 = ssub.f32 0.0, %s320_s5 }
  0x2d   :  { %s518_s13 = sld [smem:[#allocation2 + $0x14]]  ;;  %v112_v61 = vadd.f32 %v111_v46, %v107_v49 }
  0x2e   :  { %v127_v41 = vstv %s126_s12  ;;  %s526_s18 = sld [smem:[#allocation2 + $0x15]] }
  0x2f   :  { %s130_s23 = ssub.f32 0.0, %s321_s17  ;;  %v128_v43 = vmul.f32 %v127_v41, %v460_v0  ;;  %v117_v8 = vadd.f32 %v116_v59, %v112_v61 }
  0x30   :  { %s135_s24 = ssub.f32 0.0, %s322_s22 }
  0x31   :  { %v131_v47 = vstv %s130_s23  ;;  %s140_s30 = ssub.f32 0.0, %s323_s11  ;;  %v120_v17 = vsub.f32 %v117_v8, %v119_v11 }
  0x32   :  { %v132_v51 = vmul.f32 %v131_v47, %v465_v1  ;;  %v136_v52 = vstv %s135_s24  ;;  %s326_s27 = sld [smem:[#allocation2 + $0x16]] }
  0x33   :  { %v137_v53 = vmul.f32 %v136_v52, %v473_v6  ;;  %v141_v54 = vstv %s140_s30  ;;  %s145_s25 = ssub.f32 0.0, %s518_s13  ;;  %v121_v27 = vmul.f32 1.442695, %v120_v17 }
  0x34   :  { %v133_v55 = vadd.f32 %v132_v51, %v128_v43  ;;  %v142_v56 = vmul.f32 %v141_v54, %v483_v15  ;;  %s150_s7 = ssub.f32 0.0, %s526_s18 }
  0x35   :  { %v146_v60 = vstv %s145_s25  ;;  %s327_s0 = sld [smem:[#allocation2 + $0x17]]  ;;  %355 = vpow2.f32 %v121_v27 }
  0x36   :  { %v138_v62 = vadd.f32 %v137_v53, %v133_v55  ;;  %v147_v63 = vmul.f32 %v146_v60, %v498_v22  ;;  %v151_v2 = vstv %s150_s7  ;;  %s548_s20 = sld [smem:[#allocation2 + $0x22]] }
  0x37   :  { %s329_s28 = sld [smem:[#allocation2 + $0x18]]  ;;  %v152_v4 = vmul.f32 %v151_v2, %v510_v29 }
  0x38   :  { %v143_v3 = vadd.f32 %v142_v56, %v138_v62  ;;  %s155_s3 = ssub.f32 0.0, %s326_s27 }
  0x39   :  { %s330_s4 = sld [smem:[#allocation2 + $0x19]] }
  0x3a   :  { %v148_v9 = vadd.f32 %v147_v63, %v143_v3  ;;  %v156_v10 = vstv %s155_s3  ;;  %s331_s16 = sld [smem:[#allocation2 + $0x1a]] }
  0x3b   :  { %v157_v12 = vmul.f32 %v156_v10, %v523_v37  ;;  %s160_s21 = ssub.f32 0.0, %s327_s0 }
  0x3c   :  { %v153_v13 = vadd.f32 %v152_v4, %v148_v9  ;;  %s332_s5 = sld [smem:[#allocation2 + $0x1b]]  ;;  %v165_v20 = vstv %s548_s20 }
  0x3d   :  { %v161_v16 = vstv %s160_s21  ;;  %s172_s6 = ssub.f32 0.0, %s329_s28 }
  0x3e   :  { %v158_v18 = vadd.f32 %v157_v12, %v153_v13  ;;  %v162_v19 = vmul.f32 %v161_v16, %v536_v48  ;;  %s333_s8 = sld [smem:[#allocation2 + $0x1c]] }
  0x3f   :  { %v173_v21 = vstv %s172_s6  ;;  %s176_s26 = ssub.f32 0.0, %s330_s4 }
  0x40   :  { %v163_v23 = vadd.f32 %v162_v19, %v158_v18  ;;  %v174_v24 = vmul.f32 %v173_v21, %v460_v0  ;;  %s181_s29 = ssub.f32 0.0, %s331_s16 }
  0x41   :  { %v177_v26 = vstv %s176_s26  ;;  %s334_s9 = sld [smem:[#allocation2 + $0x1d]] }
  0x42   :  { %v166_v28 = vsub.f32 %v163_v23, %v165_v20  ;;  %v178_v30 = vmul.f32 %v177_v26, %v465_v1  ;;  %v182_v31 = vstv %s181_s29  ;;  %s186_s10 = ssub.f32 0.0, %s332_s5 }
  0x43   :  { %v183_v32 = vmul.f32 %v182_v31, %v473_v6  ;;  %s335_s17 = sld [smem:[#allocation2 + $0x1e]] }
  0x44   :  { %v179_v33 = vadd.f32 %v178_v30, %v174_v24  ;;  %v187_v34 = vstv %s186_s10  ;;  %s191_s22 = ssub.f32 0.0, %s333_s8  ;;  %v167_v0 = vmul.f32 1.442695, %v166_v28 }
  0x45   :  { %v188_v35 = vmul.f32 %v187_v34, %v483_v15  ;;  %s336_s11 = sld [smem:[#allocation2 + $0x1f]]  ;;  %v354_v15 = vpop.eup %353 }
  0x46   :  { %v184_v36 = vadd.f32 %v183_v32, %v179_v33  ;;  %v192_v38 = vstv %s191_s22  ;;  %s337_s12 = sld [smem:[#allocation2 + $0x23]]  ;;  %357 = vpow2.f32 %v167_v0  ;;  %v356_v43 = vpop.eup %355  ;;  %v77_v46 = vadd.f32 1.0, %v354_v15 }
  0x47   :  { %v193_v39 = vmul.f32 %v192_v38, %v498_v22  ;;  %s196_s13 = ssub.f32 0.0, %s334_s9  ;;  %v123_v50 = vadd.f32 1.0, %v356_v43 }
  0x48   :  { %v189_v1 = vadd.f32 %v188_v35, %v184_v36  ;;  %s561_s14 = sld [smem:[#allocation2 + $0x24]]  ;;  %359 = vrcp.f32 %v77_v46 }
  0x49   :  { %v197_v6 = vstv %s196_s13  ;;  %s201_s15 = ssub.f32 0.0, %s335_s17  ;;  %361 = vrcp.f32 %v123_v50  ;;  %s422_s17 = smov [#allocation5]  }
  0x4a   :  { %v194_v40 = vadd.f32 %v193_v39, %v189_v1  ;;  %v198_v41 = vmul.f32 %v197_v6, %v510_v29  ;;  %s564_s18 = sld [smem:[#allocation2 + $0x25]]  ;;  %s291_s22 = sshll.u32 %s422_s17, 4  ;;  %s292_s22 = int_to_ptr.vmem [resolvable:$true] %s291_s22 }
  0x4b   :  { %v202_v42 = vstv %s201_s15  ;;  %s206_s23 = ssub.f32 0.0, %s336_s11  ;;  %s293_s13 = sshll.u32 %s584_s2, 4  ;;  %s294_s13 = int_to_ptr.hbm [resolvable:$true] %s293_s13 }
  0x4c   :  { %v199_v44 = vadd.f32 %v198_v41, %v194_v40  ;;  %v203_v22 = vmul.f32 %v202_v42, %v523_v37  ;;  %v211_v51 = vstv %s337_s12  ;;  %s568_s24 = sld [smem:[#allocation2 + $0x26]]  ;;  %v358_v29 = vpop.eup %357 }
  0x4d   :  { %v207_v45 = vstv %s206_s23  ;;  %s570_s30 = sld [smem:[#allocation2 + $0x27]]  ;;  %v169_v37 = vadd.f32 1.0, %v358_v29 }
  0x4e   :  { %v204_v47 = vadd.f32 %v203_v22, %v199_v44  ;;  %v208_v49 = vmul.f32 %v207_v45, %v536_v48  ;;  %s343_s19 = sld [smem:[#allocation2 + $0x28]]  ;;  %v360_v48 = vpop.eup %359 }
  0x4f   :  { %s218_s1 = ssub.f32 0.0, %s561_s14  ;;  %v362_v55 = vpop.eup %361 }
  0x50   :  { %v209_v52 = vadd.f32 %v208_v49, %v204_v47  ;;  %s222_s27 = ssub.f32 0.0, %s564_s18 }
  0x51   :  { %s344_s25 = sld [smem:[#allocation2 + $0x29]]  ;;  %v219_v56 = vstv %s218_s1 }
  0x52   :  { %v212_v53 = vsub.f32 %v209_v52, %v211_v51  ;;  %s345_s7 = sld [smem:[#allocation2 + $0x2a]]  ;;  %v223_v57 = vstv %s222_s27  ;;  %v220_v60 = vmul.f32 %v360_v48, %v219_v56 }
  0x53   :  { %s574_s0 = sld [smem:[#allocation2 + $0x2b]]  ;;  %v224_v61 = vmul.f32 %v362_v55, %v223_v57 }
  0x54   :  { %v213_v54 = vmul.f32 1.442695, %v212_v53  ;;  %s244_s20 = ssub.f32 0.0, %s343_s19 }
  0x55   :  { %s227_s28 = ssub.f32 0.0, %s568_s24  ;;  %v225_v8 = vadd.f32 %v224_v61, %v220_v60 }
  0x56   :  { %363 = vpow2.f32 %v213_v54  ;;  %v245_v58 = vstv %s244_s20  ;;  %s342_s16 = sld [smem:[#allocation2 + $0x2c]] }
  0x57   :  { %365 = vrcp.f32 %v169_v37  ;;  %s248_s3 = ssub.f32 0.0, %s344_s25  ;;  %v246_v62 = vmul.f32 %v360_v48, %v245_v58  ;;  %v228_v4 = vstv %s227_s28 }
  0x58   :  { %s253_s4 = ssub.f32 0.0, %s345_s7 }
  0x59   :  { %v249_v63 = vstv %s248_s3  ;;  %s232_s21 = ssub.f32 0.0, %s570_s30 }
  0x5a   :  { %v250_v5 = vmul.f32 %v362_v55, %v249_v63  ;;  %v254_v7 = vstv %s253_s4  ;;  %s347_s5 = sld [smem:[#allocation2 + $0x2d]] }
  0x5b   :  { %s258_s6 = ssub.f32 0.0, %s574_s0  ;;  %v233_v12 = vstv %s232_s21 }
  0x5c   :  { %v364_v59 = vpop.eup %363  ;;  %v251_v10 = vadd.f32 %v250_v5, %v246_v62  ;;  %v237_v20 = vstv %s342_s16  ;;  %s348_s8 = sld [smem:[#allocation2 + $0x2e]] }
  0x5d   :  { %v366_v2 = vpop.eup %365  ;;  %v215_v3 = vadd.f32 1.0, %v364_v59  ;;  %v259_v13 = vstv %s258_s6  ;;  %s349_s26 = sld [smem:[#allocation2 + $0x2f]] }
  0x5e   :  { %v229_v9 = vmul.f32 %v366_v2, %v228_v4  ;;  %v255_v11 = vmul.f32 %v366_v2, %v254_v7  ;;  %s350_s29 = sld [smem:[#allocation2 + $0x30]] }
  0x5f   :  { %367 = vrcp.f32 %v215_v3 }
  0x60   :  { %v230_v14 = vadd.f32 %v229_v9, %v225_v8  ;;  %v256_v16 = vadd.f32 %v255_v11, %v251_v10  ;;  %v263_v21 = vstv %s347_s5 }
  0x62   :  { %s270_s9 = ssub.f32 0.0, %s348_s8 }
  0x63   :  { %s274_s10 = ssub.f32 0.0, %s349_s26 }
  0x64   :  { %v271_v34 = vstv %s270_s9  ;;  %v279_v1 = vstv %s350_s29 }
  0x65   :  { %v368_v17 = vpop.eup %367  ;;  %v275_v35 = vstv %s274_s10 }
  0x66   :  { %v234_v18 = vmul.f32 %v368_v17, %v233_v12  ;;  %v260_v19 = vmul.f32 %v368_v17, %v259_v13 }
  0x68   :  { %v235_v23 = vadd.f32 %v234_v18, %v230_v14  ;;  %v261_v24 = vadd.f32 %v260_v19, %v256_v16 }
  0x6a   :  { %v238_v25 = vsub.f32 %v235_v23, %v237_v20  ;;  %v264_v26 = vsub.f32 %v261_v24, %v263_v21 }
  0x6c   :  { %v239_v27 = vmul.f32 1.442695, %v238_v25  ;;  %v265_v28 = vmul.f32 1.442695, %v264_v26 }
  0x6e   :  { %369 = vpow2.f32 %v239_v27 }
  0x6f   :  { %371 = vpow2.f32 %v265_v28 }
  0x74   :  { %v370_v30 = vpop.eup %369 }
  0x75   :  { %v372_v31 = vpop.eup %371  ;;  %v241_v32 = vadd.f32 1.0, %v370_v30 }
  0x76   :  { %v267_v33 = vadd.f32 1.0, %v372_v31 }
  0x77   :  { %373 = vrcp.f32 %v241_v32 }
  0x78   :  { %375 = vrcp.f32 %v267_v33 }
  0x7d   :  { %v374_v0 = vpop.eup %373 }
  0x7e   :  { %v376_v36 = vpop.eup %375  ;;  %v272_v38 = vmul.f32 %v374_v0, %v271_v34 }
  0x7f   :  { %v276_v39 = vmul.f32 %v376_v36, %v275_v35 }
  0x81   :  { %v277_v6 = vadd.f32 %v276_v39, %v272_v38 }
  0x83   :  { %v280_v40 = vsub.f32 %v277_v6, %v279_v1 }
  0x85   :  { %v281_v41 = vmul.f32 1.442695, %v280_v40 }
  0x87   :  { %377 = vpow2.f32 %v281_v41 }
  0x8d   :  { %v378_v15 = vpop.eup %377 }
  0x8e   :  { %v283_v42 = vadd.f32 1.0, %v378_v15 }
  0x90   :  { %379 = vrcp.f32 %v283_v42 }
  0x96   :  { %v380_v43 = vpop.eup %379 }
  0x97   :  { %285 = vst [vmem:[#allocation5] sm:$0x1] %v380_v43 }
  0x98   :  { %296 = dma.vmem_to_hbm [thread:$0]  %s292_s22, 16, %s294_s13, [#allocation3]  }
  0x99   :  { %419 = dma.done.wait [#allocation3], 16  }
  0x9a   :  { %420 = vsyncadd [#allocation3], 4294967280 }
  0x9b   :  { %301 = vsyncpa [#allocation3], 1 }
  0x9c   :  { %302 = vsyncpa [#allocation4], 1 }

</bundles_post_ra>
